<compile_context>
chip_gen: v7x
topology: tpu7x:2x2x1
jax: 0.10.0
libtpu: 0.0.40
codegen_flags: <defaults>
</compile_context>

<pallas_src>
import functools

import jax
import jax.numpy as jnp
from jax.experimental import pallas as pl
from jax.experimental.pallas import tpu as pltpu


# ----------------------------------------------------------------------------
# Kernels
# ----------------------------------------------------------------------------
def _matmul_bias_kernel(x_ref, w_ref, b_ref, o_ref):
    # Full-K path: one MXU pass, f32 accumulate inside the dot, f32 bias add.
    o_ref[...] = (jnp.dot(x_ref[...], w_ref[...],
                          preferred_element_type=jnp.float32)
                  + b_ref[...]).astype(o_ref.dtype)


def _matmul_bias_acc_kernel(x_ref, w_ref, b_ref, o_ref, acc_ref):
    # Tiled-K path: f32 VMEM accumulator resident across the k grid axis.
    k = pl.program_id(2)

    @pl.when(k == 0)
    def _init():
        acc_ref[...] = jnp.zeros_like(acc_ref)

    acc_ref[...] += jnp.dot(x_ref[...], w_ref[...],
                            preferred_element_type=jnp.float32)

    @pl.when(k == pl.num_programs(2) - 1)
    def _finalize():
        o_ref[...] = (acc_ref[...] + b_ref[...]).astype(o_ref.dtype)


# ----------------------------------------------------------------------------
# Tiling plan
# ----------------------------------------------------------------------------
def _round_up(v, m):
    return -(-v // m) * m


def _plan_tiles(B, Kp, Np, x_itemsize, w_itemsize,
                tm_max=512, tk_max=2048, vmem_budget=14 * 1024 * 1024):
    # Batch: balanced split at the packed-sublane granularity of the streamed
    # dtype (16 rows for bf16) -> padding waste bounded by one sublane group.
    sub = {1: 32, 2: 16, 4: 8}.get(x_itemsize, 8)
    num_m = max(1, -(-B // tm_max))
    tm = _round_up(-(-B // num_m), sub)
    Bp = num_m * tm

    # N tile: multiple of 256 (full v6e/v7x MXU width); prefer >= 2 N blocks
    # so both v7x TensorCores / v6e megacore halves have work.
    tn = 512 if (Np % 512 == 0 and Np // 512 >= 2) else 256

    def vmem_bytes(tk_, tn_):
        return (2 * tm * tk_ * x_itemsize      # x tile, double-buffered
                + 2 * tk_ * tn_ * w_itemsize   # w tile, double-buffered
                + 2 * tm * tn_ * 4             # f32 out tile, double-buffered
                + 2 * tn_ * 4                  # bias tile
                + tm * tn_ * 4)                # f32 accumulator (tiled-K only)

    # Small-batch LoRA-serving case: whole reduction in one block -> a single
    # streaming pass over the weight, no accumulator, no per-k grid overhead.
    if Bp <= 64:
        for tn_try in sorted({tn, 256}, reverse=True):
            if vmem_bytes(Kp, tn_try) <= vmem_budget:
                return Bp, tm, tn_try, Kp

    # Otherwise: largest MXU-aligned K tile that divides Kp and fits VMEM.
    tk = 256
    for cand in (2048, 1024, 512):
        if cand <= tk_max and Kp % cand == 0 and vmem_bytes(cand, tn) <= vmem_budget:
            tk = cand
            break
    return Bp, tm, tn, tk


# ----------------------------------------------------------------------------
# One-time weight preparation (amortized across forward calls)
# ----------------------------------------------------------------------------
def build_svd_linear_base(weight, bias, stream_dtype=jnp.bfloat16):
    """Pre-transpose the frozen base weight, cast it to the MXU streaming dtype
    and zero-pad to (8,128)/MXU-aligned extents ONCE.

    weight: (out_features, in_features)   bias: (out_features,)
    returns (w_t_pad: (Kp, Np) stream_dtype, bias_pad: (1, Np) float32)
    """
    n_out, n_in = weight.shape
    Kp, Np = _round_up(n_in, 256), _round_up(n_out, 256)
    w_t = jnp.pad(weight.T.astype(stream_dtype),
                  ((0, Kp - n_in), (0, Np - n_out)))
    b = jnp.pad(bias.astype(jnp.float32), (0, Np - n_out)).reshape(1, Np)
    return w_t, b


# ----------------------------------------------------------------------------
# Forward
# ----------------------------------------------------------------------------
@functools.partial(jax.jit, static_argnames=("n_out",))
def svd_linear_forward(x, w_t_pad, bias_pad, lora_A, lora_B, lora_E,
                       indices_m, indices_n, scaling, ranknum, *, n_out):
    """Fused SVDLinear forward.

    x:        (B, in_features) float32
    w_t_pad:  (Kp, Np) padded, pre-transposed base weight (bf16 stream dtype)
    bias_pad: (1, Np) float32
    lora_A:   (r, fan_out)   lora_B: (fan_in, r)   lora_E: (r, 1)
    indices_m: (fan_out,) unique output-column indices
    indices_n: (fan_in,)  unique input-column indices
    returns (B, n_out) float32
    """
    B, K = x.shape
    Kp, Np = w_t_pad.shape
    itemsize = jnp.dtype(w_t_pad.dtype).itemsize
    Bp, tm, tn, tk = _plan_tiles(B, Kp, Np, x_itemsize=itemsize,
                                 w_itemsize=itemsize)

    # Only x is padded per call (weight / bias were padded at build time).
    x_s = x.astype(w_t_pad.dtype)
    if (Bp, Kp) != (B, K):
        x_s = jnp.pad(x_s, ((0, Bp - B), (0, Kp - K)))

    gm, gn, gk = Bp // tm, Np // tn, Kp // tk
    cost = pl.CostEstimate(
        flops=2 * Bp * Kp * Np,
        transcendentals=0,
        bytes_accessed=Bp * Kp * itemsize + Kp * Np * itemsize
        + Bp * Np * 4 + Np * 4)
    cparams = dict(vmem_limit_bytes=32 * 1024 * 1024)

    if gk == 1:
        base = pl.pallas_call(
            _matmul_bias_kernel,
            out_shape=jax.ShapeDtypeStruct((Bp, Np), jnp.float32),
            grid_spec=pltpu.PrefetchScalarGridSpec(
                num_scalar_prefetch=0,
                grid=(gm, gn),
                in_specs=[
                    pl.BlockSpec((tm, Kp), lambda i, j: (i, 0)),   # x
                    pl.BlockSpec((Kp, tn), lambda i, j: (0, j)),   # W.T (padded)
                    pl.BlockSpec((1, tn), lambda i, j: (0, j)),    # bias
                ],
                out_specs=pl.BlockSpec((tm, tn), lambda i, j: (i, j)),
            ),
            compiler_params=pltpu.CompilerParams(
                dimension_semantics=("parallel", "parallel"), **cparams),
            cost_estimate=cost,
        )(x_s, w_t_pad, bias_pad)
    else:
        base = pl.pallas_call(
            _matmul_bias_acc_kernel,
            out_shape=jax.ShapeDtypeStruct((Bp, Np), jnp.float32),
            grid_spec=pltpu.PrefetchScalarGridSpec(
                num_scalar_prefetch=0,
                grid=(gm, gn, gk),
                in_specs=[
                    pl.BlockSpec((tm, tk), lambda i, j, k: (i, k)),   # x
                    pl.BlockSpec((tk, tn), lambda i, j, k: (k, j)),   # W.T
                    pl.BlockSpec((1, tn), lambda i, j, k: (0, j)),    # bias
                ],
                out_specs=pl.BlockSpec((tm, tn), lambda i, j, k: (i, j)),
                scratch_shapes=[pltpu.VMEM((tm, tn), jnp.float32)],
            ),
            compiler_params=pltpu.CompilerParams(
                dimension_semantics=("parallel", "parallel", "arbitrary"),
                **cparams),
            cost_estimate=cost,
        )(x_s, w_t_pad, bias_pad)

    base = base[:B, :n_out]

    # Rank-r AdaLoRA correction, exact in f32.  The (in, out) residual is both
    # sparse (rows indices_n, cols indices_m) and rank <= r, so
    #   (x @ residual)[:, indices_m] == (x[:, indices_n] @ lora_B) @ (lora_A*lora_E)
    # Applying it separately (instead of folding into the bf16 weight) keeps
    # the ~1e-4-scale update from being quantized away by the bf16 stream.
    # TODO(synk): the column gather/scatter has no clean in-kernel Pallas TPU
    # form; this O(B*(fan_in+fan_out)*r) path stays in plain JAX.
    scale = scaling / (ranknum + 1e-5)
    x32 = x.astype(jnp.float32)
    low = (x32[:, indices_n] @ lora_B.astype(jnp.float32)) @ (
        (lora_A * lora_E).astype(jnp.float32))                      # (B, fan_out)
    corr = jnp.zeros((B, n_out), jnp.float32).at[:, indices_m].set(low * scale)
    return base + corr


# ----------------------------------------------------------------------------
# Self-test
# ----------------------------------------------------------------------------
if __name__ == "__main__":

    def run_case(key, batch, in_f, out_f, r, fan_out, fan_in, lora_alpha):
        ks = jax.random.split(key, 6)
        x = jax.random.normal(ks[0], (batch, in_f), dtype=jnp.float32)
        weight = 0.05 * jax.random.normal(ks[1], (out_f, in_f), dtype=jnp.float32)
        bias = 0.05 * jax.random.normal(ks[2], (out_f,), dtype=jnp.float32)
        # reset_lora_parameters: normal(mean=0, std=0.02)
        lora_A = 0.02 * jax.random.normal(ks[3], (r, fan_out), dtype=jnp.float32)
        lora_B = 0.02 * jax.random.normal(ks[4], (fan_in, r), dtype=jnp.float32)
        lora_E = 0.02 * jax.random.normal(ks[5], (r, 1), dtype=jnp.float32)
        # Deterministic unique, sorted pruned-index sets (torch.unique sorts).
        indices_m = jnp.arange(fan_out, dtype=jnp.int32) * (out_f // fan_out)
        indices_n = jnp.arange(fan_in, dtype=jnp.int32) * (in_f // fan_in)
        scaling = float(lora_alpha) if lora_alpha > 0 else float(r)
        ranknum = float(r)    # ranknum.data.fill_(float(r))

        w_t_pad, b_pad = build_svd_linear_base(weight, bias)   # once per model
        out = svd_linear_forward(x, w_t_pad, b_pad, lora_A, lora_B, lora_E,
                                 indices_m, indices_n, scaling, ranknum,
                                 n_out=out_f)
        out = jax.block_until_ready(out)
        assert out.shape == (batch, out_f)

        hp = jax.lax.Precision.HIGHEST
        adalora = (lora_A * lora_E).T @ lora_B.T                    # (fan_out, fan_in)
        mm, nn_ = jnp.meshgrid(indices_m, indices_n, indexing="ij")
        residual = jnp.zeros((in_f, out_f), jnp.float32)
        residual = residual.at[nn_.ravel(), mm.ravel()].set(adalora.ravel())
        lora_term = jnp.dot(x, residual, precision=hp) * scaling / (ranknum + 1e-5)

        # PyTorch-semantics f32 reference (lora_dropout = Identity).
        ref32 = jnp.dot(x, weight.T, precision=hp) + bias[None, :] + lora_term
        # Matched-quantization reference (same bf16 rounding as the stream).
        xq = x.astype(jnp.bfloat16).astype(jnp.float32)
        wq = weight.T.astype(jnp.bfloat16).astype(jnp.float32)
        refq = jnp.dot(xq, wq, precision=hp) + bias[None, :] + lora_term

        err_q = float(jnp.max(jnp.abs(out - refq)))
        err_32 = float(jnp.max(jnp.abs(out - ref32)))
        assert jnp.allclose(out, refq, atol=2e-3, rtol=2e-3), \
            f"mismatch vs bf16-matched reference (max abs err {err_q})"
        assert jnp.allclose(out, ref32, atol=6e-2, rtol=6e-2), \
            f"mismatch vs f32 reference (max abs err {err_32})"

    key = jax.random.PRNGKey(0)
    k1, k2 = jax.random.split(key)
    # Small-batch LoRA-serving case -> full-K single-pass kernel, grid (1, 2).
    run_case(k1, batch=16, in_f=384, out_f=320, r=4,
             fan_out=16, fan_in=32, lora_alpha=8)
    # Larger batch / unaligned K -> tiled-K accumulator kernel, grid (1, 2, 3).
    run_case(k2, batch=96, in_f=700, out_f=320, r=4,
             fan_out=24, fan_in=40, lora_alpha=8)

    print("KERNEL_OK")
</pallas_src>

<mosaic_0001>
module attributes {stable_mosaic.version = 11 : i64} {
  func.func @_matmul_bias_kernel(%arg0: i32, %arg1: i32, %arg2: memref<16x512xbf16, #tpu.memory_space<vmem>>, %arg3: memref<512x256xbf16, #tpu.memory_space<vmem>>, %arg4: memref<1x256xf32, #tpu.memory_space<vmem>>, %arg5: memref<16x256xf32, #tpu.memory_space<vmem>>) attributes {dimension_semantics = [#tpu.dimension_semantics<parallel>, #tpu.dimension_semantics<parallel>], iteration_bounds = array<i64: 1, 2>, scalar_prefetch = 0 : i64, scratch_operands = 0 : i64, tpu.core_type = #tpu.core_type<tc>, window_params = [{transform_indices = @transform_0, window_bounds = array<i64: 16, 512>}, {transform_indices = @transform_1, window_bounds = array<i64: 512, 256>}, {transform_indices = @transform_2, window_bounds = array<i64: 1, 256>}, {transform_indices = @transform_3, window_bounds = array<i64: 16, 256>}]} {
    %c0 = arith.constant 0 : index
    %c0_0 = arith.constant 0 : index
    %0 = vector.load %arg2[%c0, %c0_0] : memref<16x512xbf16, #tpu.memory_space<vmem>>, vector<16x512xbf16>
    %c0_1 = arith.constant 0 : index
    %c0_2 = arith.constant 0 : index
    %1 = vector.load %arg3[%c0_1, %c0_2] : memref<512x256xbf16, #tpu.memory_space<vmem>>, vector<512x256xbf16>
    %cst = arith.constant dense<0.000000e+00> : vector<16x256xf32>
    %2 = tpu.matmul %0, %1, %cst {dimension_numbers = #tpu.dot_dimension_numbers<[1], [0], [0], [1], [0, 0, 1, 1], [], []>} : vector<16x512xbf16>, vector<512x256xbf16>, vector<16x256xf32> -> vector<16x256xf32>
    %c0_3 = arith.constant 0 : index
    %c0_4 = arith.constant 0 : index
    %3 = vector.load %arg4[%c0_3, %c0_4] : memref<1x256xf32, #tpu.memory_space<vmem>>, vector<1x256xf32>
    %4 = vector.broadcast %3 : vector<1x256xf32> to vector<16x256xf32>
    %5 = arith.addf %2, %4 : vector<16x256xf32>
    %c0_5 = arith.constant 0 : index
    %c0_6 = arith.constant 0 : index
    %6 = vector.load %arg5[%c0_5, %c0_6] : memref<16x256xf32, #tpu.memory_space<vmem>>, vector<16x256xf32>
    tpu.vector_store %arg5[%c0_5, %c0_6], %5 {strides = array<i32>} : memref<16x256xf32, #tpu.memory_space<vmem>>, vector<16x256xf32>,
    return
  }
  func.func @transform_0(%arg0: i32, %arg1: i32) -> (i32, i32) {
    %c0_i32 = arith.constant 0 : i32
    %c0_i32_0 = arith.constant 0 : i32
    return %arg0, %c0_i32 : i32, i32
  }
  func.func @transform_1(%arg0: i32, %arg1: i32) -> (i32, i32) {
    %c0_i32 = arith.constant 0 : i32
    %c0_i32_0 = arith.constant 0 : i32
    return %c0_i32, %arg1 : i32, i32
  }
  func.func @transform_2(%arg0: i32, %arg1: i32) -> (i32, i32) {
    %c0_i32 = arith.constant 0 : i32
    %c0_i32_0 = arith.constant 0 : i32
    return %c0_i32, %arg1 : i32, i32
  }
  func.func @transform_3(%arg0: i32, %arg1: i32) -> (i32, i32) {
    %c0_i32 = arith.constant 0 : i32
    return %arg0, %arg1 : i32, i32
  }
}

</mosaic_0001>

<bundles_post_ra>
// kernel: svd_linear_forward.1
= control target key start
LH: loop header
LB: loop body
LE: loop exit
PB: predicated region body
PF: predicated region fallthrough
CT: control target
= control target key end

     0   :  { %s1448_s12 = smov 0   ;;  %s1450_s13 = smov 0   ;;  %s1738_s0 = inlined_call_operand.vmem [shape: bf16[16,512], index: 0, kind: input, shape index: {}]   ;;  %s1739_s1 = inlined_call_operand.vmem [shape: bf16[512,512], index: 1, kind: input, shape index: {}]   ;;  %s1740_s2 = inlined_call_operand.vmem [shape: f32[1,512], index: 2, kind: input, shape index: {}]   ;;  %s1741_s3 = inlined_call_operand.vmem [shape: f32[16,512], index: 3, kind: output, shape index: {}]  }
   0x1   :  { %s1452_s14 = smov 0   ;;  %s1454_s15 = smov 0  }
   0x2   :  { %s1456_s16 = smov 0  }
   0x3 LB: > { %s22_s17 = sadd.s32 1, %s1422_s15  ;;  %s1151_s18 = sadd.s32 4294967295, %s1426_s16   ;;  %s1426_s16 = sphi %s1456_s16, %s13_s16   ;;  %s1422_s15 = sphi %s1454_s15, %s1746_s15   ;;  %s1418_s14 = sphi %s1452_s14, %s1745_s14   ;;  %s1414_s13 = sphi %s1450_s13, %s1744_s13   ;;  %s1410_s12 = sphi %s1448_s12, %s1743_s12  }
   0x4   : > { %p23_p0 = scmp.ge.s32.totalorder %s22_s17, 2  ;;  %p65_p1 = scmp.ne.s32.totalorder %s1414_s13, %s1410_s12 }
   0x5   : > { %p66_p2 = scmp.eq.s32.totalorder %s1426_s16, 0  ;;  %p123_p4 = scmp.eq.s32.totalorder %s1151_s18, 1 }
   0x6   : > { %s1748_s17 = smov (%p23_p0, %s22_s17), 0  ;;  %s58_s20 = sadd.s32 1, %s1414_s13 }
   0x7   : > { %p67_p3 = por %p66_p2, %p65_p1  ;;  %s55_s19 = ssub.s32 %s1422_s15, %s1748_s17 }
   0x8   : > { %p56_p5 = scmp.eq.s32.totalorder %s55_s19, 0  ;;  %p1483_p6 = por %p123_p4, %p65_p1 }
   0x9   : > { %p1155_p7 = scmp.ge.s32.totalorder %s1426_s16, 2 }
   0xa   : > { %s1488_s22 = scalar_select %p56_p5, %s1414_s13, %s58_s20  }
   0xb   : > { %155 = sbr.rel (%p1155_p7) target bundleno = 54 (0x36), region = 20 }
  0x12   : > { %158 = sbr.rel (!%p67_p3) target bundleno = 54 (0x36), region = 24  ;;  %s160_s23 = sand.u32 (%p67_p3), 1, %s1414_s13  }
  0x13   : > { %s1236_s24 = sshll.u32 (%p67_p3), %s1422_s15, 3  ;;  %s1156_s25 = sshll.u32 (%p67_p3), %s160_s23, 9 }
  0x14   : > { %s1496_s28 = scalar_lea.vmem (%p67_p3), %s1739_s1, %s1236_s24  ;;  %s1501_s29 = scalar_lea.vmem (%p67_p3), [#allocation2], %s1156_s25 }
  0x15   : > { %v319_v0 = vld [vmem:[%s1496_s28] sm:$0xff] (%p67_p3)  ;;  %v321_v1 = vld [vmem:[%s1496_s28 + $0x10] sm:$0xff] (%p67_p3) }
  0x16   : > { %v323_v2 = vld [vmem:[%s1496_s28 + $0x20] sm:$0xff] (%p67_p3)  ;;  %320 = vst [vmem:[%s1501_s29] sm:$0xff] (%p67_p3), %v319_v0  ;;  %322 = vst [vmem:[%s1501_s29 + $0x8] sm:$0xff] (%p67_p3), %v321_v1  ;;  %v325_v3 = vld [vmem:[%s1496_s28 + $0x30] sm:$0xff] (%p67_p3) }
  0x17   : > { %324 = vst [vmem:[%s1501_s29 + $0x10] sm:$0xff] (%p67_p3), %v323_v2  ;;  %v327_v4 = vld [vmem:[%s1496_s28 + $0x40] sm:$0xff] (%p67_p3)  ;;  %v329_v5 = vld [vmem:[%s1496_s28 + $0x50] sm:$0xff] (%p67_p3)  ;;  %326 = vst [vmem:[%s1501_s29 + $0x18] sm:$0xff] (%p67_p3), %v325_v3 }
  0x18   : > { %328 = vst [vmem:[%s1501_s29 + $0x20] sm:$0xff] (%p67_p3), %v327_v4  ;;  %330 = vst [vmem:[%s1501_s29 + $0x28] sm:$0xff] (%p67_p3), %v329_v5  ;;  %v331_v6 = vld [vmem:[%s1496_s28 + $0x60] sm:$0xff] (%p67_p3)  ;;  %v333_v7 = vld [vmem:[%s1496_s28 + $0x70] sm:$0xff] (%p67_p3) }
  0x19   : > { %v335_v8 = vld [vmem:[%s1496_s28 + $0x80] sm:$0xff]  ;;  %332 = vst [vmem:[%s1501_s29 + $0x30] sm:$0xff] %v331_v6  ;;  %334 = vst [vmem:[%s1501_s29 + $0x38] sm:$0xff] %v333_v7  ;;  %v337_v9 = vld [vmem:[%s1496_s28 + $0x90] sm:$0xff] }
  0x1a   : > { %336 = vst [vmem:[%s1501_s29 + $0x40] sm:$0xff] %v335_v8  ;;  %v339_v10 = vld [vmem:[%s1496_s28 + $0xa0] sm:$0xff]  ;;  %v341_v11 = vld [vmem:[%s1496_s28 + $0xb0] sm:$0xff]  ;;  %338 = vst [vmem:[%s1501_s29 + $0x48] sm:$0xff] %v337_v9 }
  0x1b   : > { %340 = vst [vmem:[%s1501_s29 + $0x50] sm:$0xff] %v339_v10  ;;  %342 = vst [vmem:[%s1501_s29 + $0x58] sm:$0xff] %v341_v11  ;;  %v343_v12 = vld [vmem:[%s1496_s28 + $0xc0] sm:$0xff]  ;;  %v345_v13 = vld [vmem:[%s1496_s28 + $0xd0] sm:$0xff] }
  0x1c   : > { %v347_v14 = vld [vmem:[%s1496_s28 + $0xe0] sm:$0xff]  ;;  %344 = vst [vmem:[%s1501_s29 + $0x60] sm:$0xff] %v343_v12  ;;  %346 = vst [vmem:[%s1501_s29 + $0x68] sm:$0xff] %v345_v13  ;;  %v349_v15 = vld [vmem:[%s1496_s28 + $0xf0] sm:$0xff] }
  0x1d   : > { %348 = vst [vmem:[%s1501_s29 + $0x70] sm:$0xff] %v347_v14  ;;  %v351_v16 = vld [vmem:[%s1496_s28 + $0x100] sm:$0xff]  ;;  %v353_v17 = vld [vmem:[%s1496_s28 + $0x110] sm:$0xff]  ;;  %350 = vst [vmem:[%s1501_s29 + $0x78] sm:$0xff] %v349_v15 }
  0x1e   : > { %352 = vst [vmem:[%s1501_s29 + $0x80] sm:$0xff] %v351_v16  ;;  %354 = vst [vmem:[%s1501_s29 + $0x88] sm:$0xff] %v353_v17  ;;  %v355_v18 = vld [vmem:[%s1496_s28 + $0x120] sm:$0xff]  ;;  %v357_v19 = vld [vmem:[%s1496_s28 + $0x130] sm:$0xff] }
  0x1f   : > { %v359_v20 = vld [vmem:[%s1496_s28 + $0x140] sm:$0xff]  ;;  %356 = vst [vmem:[%s1501_s29 + $0x90] sm:$0xff] %v355_v18  ;;  %358 = vst [vmem:[%s1501_s29 + $0x98] sm:$0xff] %v357_v19  ;;  %v361_v21 = vld [vmem:[%s1496_s28 + $0x150] sm:$0xff] }
  0x20   : > { %360 = vst [vmem:[%s1501_s29 + $0xa0] sm:$0xff] %v359_v20  ;;  %v363_v22 = vld [vmem:[%s1496_s28 + $0x160] sm:$0xff]  ;;  %v365_v23 = vld [vmem:[%s1496_s28 + $0x170] sm:$0xff]  ;;  %362 = vst [vmem:[%s1501_s29 + $0xa8] sm:$0xff] %v361_v21 }
  0x21   : > { %364 = vst [vmem:[%s1501_s29 + $0xb0] sm:$0xff] %v363_v22  ;;  %366 = vst [vmem:[%s1501_s29 + $0xb8] sm:$0xff] %v365_v23  ;;  %v367_v24 = vld [vmem:[%s1496_s28 + $0x180] sm:$0xff]  ;;  %v369_v25 = vld [vmem:[%s1496_s28 + $0x190] sm:$0xff] }
  0x22   : > { %v371_v26 = vld [vmem:[%s1496_s28 + $0x1a0] sm:$0xff]  ;;  %368 = vst [vmem:[%s1501_s29 + $0xc0] sm:$0xff] %v367_v24  ;;  %370 = vst [vmem:[%s1501_s29 + $0xc8] sm:$0xff] %v369_v25  ;;  %v373_v27 = vld [vmem:[%s1496_s28 + $0x1b0] sm:$0xff] }
  0x23   : > { %372 = vst [vmem:[%s1501_s29 + $0xd0] sm:$0xff] %v371_v26  ;;  %v375_v28 = vld [vmem:[%s1496_s28 + $0x1c0] sm:$0xff]  ;;  %v377_v29 = vld [vmem:[%s1496_s28 + $0x1d0] sm:$0xff]  ;;  %374 = vst [vmem:[%s1501_s29 + $0xd8] sm:$0xff] %v373_v27 }
  0x24   : > { %376 = vst [vmem:[%s1501_s29 + $0xe0] sm:$0xff] %v375_v28  ;;  %378 = vst [vmem:[%s1501_s29 + $0xe8] sm:$0xff] %v377_v29  ;;  %v379_v30 = vld [vmem:[%s1496_s28 + $0x1e0] sm:$0xff]  ;;  %v381_v31 = vld [vmem:[%s1496_s28 + $0x1f0] sm:$0xff] }
  0x25   : > { %v383_v32 = vld [vmem:[%s1496_s28 + $0x200] sm:$0xff]  ;;  %380 = vst [vmem:[%s1501_s29 + $0xf0] sm:$0xff] %v379_v30  ;;  %382 = vst [vmem:[%s1501_s29 + $0xf8] sm:$0xff] %v381_v31  ;;  %v385_v33 = vld [vmem:[%s1496_s28 + $0x210] sm:$0xff] }
  0x26   : > { %384 = vst [vmem:[%s1501_s29 + $0x100] sm:$0xff] %v383_v32  ;;  %v387_v34 = vld [vmem:[%s1496_s28 + $0x220] sm:$0xff]  ;;  %v389_v35 = vld [vmem:[%s1496_s28 + $0x230] sm:$0xff]  ;;  %386 = vst [vmem:[%s1501_s29 + $0x108] sm:$0xff] %v385_v33 }
  0x27   : > { %388 = vst [vmem:[%s1501_s29 + $0x110] sm:$0xff] %v387_v34  ;;  %390 = vst [vmem:[%s1501_s29 + $0x118] sm:$0xff] %v389_v35  ;;  %v391_v36 = vld [vmem:[%s1496_s28 + $0x240] sm:$0xff]  ;;  %v393_v37 = vld [vmem:[%s1496_s28 + $0x250] sm:$0xff] }
  0x28   : > { %v395_v38 = vld [vmem:[%s1496_s28 + $0x260] sm:$0xff]  ;;  %392 = vst [vmem:[%s1501_s29 + $0x120] sm:$0xff] %v391_v36  ;;  %394 = vst [vmem:[%s1501_s29 + $0x128] sm:$0xff] %v393_v37  ;;  %v397_v39 = vld [vmem:[%s1496_s28 + $0x270] sm:$0xff] }
  0x29   : > { %396 = vst [vmem:[%s1501_s29 + $0x130] sm:$0xff] %v395_v38  ;;  %v399_v40 = vld [vmem:[%s1496_s28 + $0x280] sm:$0xff]  ;;  %v401_v41 = vld [vmem:[%s1496_s28 + $0x290] sm:$0xff]  ;;  %398 = vst [vmem:[%s1501_s29 + $0x138] sm:$0xff] %v397_v39 }
  0x2a   : > { %400 = vst [vmem:[%s1501_s29 + $0x140] sm:$0xff] %v399_v40  ;;  %402 = vst [vmem:[%s1501_s29 + $0x148] sm:$0xff] %v401_v41  ;;  %v403_v42 = vld [vmem:[%s1496_s28 + $0x2a0] sm:$0xff]  ;;  %v405_v43 = vld [vmem:[%s1496_s28 + $0x2b0] sm:$0xff] }
  0x2b   : > { %v407_v44 = vld [vmem:[%s1496_s28 + $0x2c0] sm:$0xff]  ;;  %404 = vst [vmem:[%s1501_s29 + $0x150] sm:$0xff] %v403_v42  ;;  %406 = vst [vmem:[%s1501_s29 + $0x158] sm:$0xff] %v405_v43  ;;  %v409_v45 = vld [vmem:[%s1496_s28 + $0x2d0] sm:$0xff] }
  0x2c   : > { %408 = vst [vmem:[%s1501_s29 + $0x160] sm:$0xff] %v407_v44  ;;  %v411_v46 = vld [vmem:[%s1496_s28 + $0x2e0] sm:$0xff]  ;;  %v413_v47 = vld [vmem:[%s1496_s28 + $0x2f0] sm:$0xff]  ;;  %410 = vst [vmem:[%s1501_s29 + $0x168] sm:$0xff] %v409_v45 }
  0x2d   : > { %412 = vst [vmem:[%s1501_s29 + $0x170] sm:$0xff] %v411_v46  ;;  %414 = vst [vmem:[%s1501_s29 + $0x178] sm:$0xff] %v413_v47  ;;  %v415_v48 = vld [vmem:[%s1496_s28 + $0x300] sm:$0xff]  ;;  %v417_v49 = vld [vmem:[%s1496_s28 + $0x310] sm:$0xff] }
  0x2e   : > { %v419_v50 = vld [vmem:[%s1496_s28 + $0x320] sm:$0xff]  ;;  %416 = vst [vmem:[%s1501_s29 + $0x180] sm:$0xff] %v415_v48  ;;  %418 = vst [vmem:[%s1501_s29 + $0x188] sm:$0xff] %v417_v49  ;;  %v421_v51 = vld [vmem:[%s1496_s28 + $0x330] sm:$0xff] }
  0x2f   : > { %420 = vst [vmem:[%s1501_s29 + $0x190] sm:$0xff] %v419_v50  ;;  %v423_v52 = vld [vmem:[%s1496_s28 + $0x340] sm:$0xff]  ;;  %v425_v53 = vld [vmem:[%s1496_s28 + $0x350] sm:$0xff]  ;;  %422 = vst [vmem:[%s1501_s29 + $0x198] sm:$0xff] %v421_v51 }
  0x30   : > { %424 = vst [vmem:[%s1501_s29 + $0x1a0] sm:$0xff] %v423_v52  ;;  %426 = vst [vmem:[%s1501_s29 + $0x1a8] sm:$0xff] %v425_v53  ;;  %v427_v54 = vld [vmem:[%s1496_s28 + $0x360] sm:$0xff]  ;;  %v429_v55 = vld [vmem:[%s1496_s28 + $0x370] sm:$0xff] }
  0x31   : > { %v431_v56 = vld [vmem:[%s1496_s28 + $0x380] sm:$0xff]  ;;  %428 = vst [vmem:[%s1501_s29 + $0x1b0] sm:$0xff] %v427_v54  ;;  %430 = vst [vmem:[%s1501_s29 + $0x1b8] sm:$0xff] %v429_v55  ;;  %v433_v57 = vld [vmem:[%s1496_s28 + $0x390] sm:$0xff] }
  0x32   : > { %432 = vst [vmem:[%s1501_s29 + $0x1c0] sm:$0xff] %v431_v56  ;;  %v435_v58 = vld [vmem:[%s1496_s28 + $0x3a0] sm:$0xff]  ;;  %v437_v59 = vld [vmem:[%s1496_s28 + $0x3b0] sm:$0xff]  ;;  %434 = vst [vmem:[%s1501_s29 + $0x1c8] sm:$0xff] %v433_v57 }
  0x33   : > { %436 = vst [vmem:[%s1501_s29 + $0x1d0] sm:$0xff] %v435_v58  ;;  %438 = vst [vmem:[%s1501_s29 + $0x1d8] sm:$0xff] %v437_v59  ;;  %v439_v60 = vld [vmem:[%s1496_s28 + $0x3c0] sm:$0xff]  ;;  %v441_v61 = vld [vmem:[%s1496_s28 + $0x3d0] sm:$0xff] }
  0x34   : > { %v443_v62 = vld [vmem:[%s1496_s28 + $0x3e0] sm:$0xff]  ;;  %440 = vst [vmem:[%s1501_s29 + $0x1e0] sm:$0xff] %v439_v60  ;;  %442 = vst [vmem:[%s1501_s29 + $0x1e8] sm:$0xff] %v441_v61  ;;  %v445_v63 = vld [vmem:[%s1496_s28 + $0x3f0] sm:$0xff] }
  0x35   : > { %444 = vst [vmem:[%s1501_s29 + $0x1f0] sm:$0xff] %v443_v62  ;;  %446 = vst [vmem:[%s1501_s29 + $0x1f8] sm:$0xff] %v445_v63 }
  0x36 PF: > { %p1159_p8 = scmp.ge.s32.totalorder %s1426_s16, 1  ;;  %p459_p9 = scmp.lt.s32.totalorder %s1426_s16, 3 }
  0x38   : > { %p460_p10 = pnand %p1159_p8, %p459_p9 }
  0x39   : > { %s466_s30 = sand.u32 (!%p460_p10), 1, %s1410_s12   ;;  %v1384_v0 = vld [vmem:[%s1738_s0 + $0x4] ss:$16 sps:$4 sm:$0xff] (!%p460_p10)   ;;  %v1387_v1 = vld [vmem:[%s1738_s0 + $0xc] ss:$16 sps:$4 sm:$0xff] (!%p460_p10)   ;;  %s1162_s20 = sshll.u32 (!%p460_p10), %s1418_s14, 1 }
  0x3a   : > { %463 = sbr.rel (%p460_p10) target bundleno = 353 (0x161), region = 66  ;;  %s1160_s4 = sshll.u32 (!%p460_p10), %s466_s30, 9  ;;  %965 = vmatprep.mubr.bf16.mxu1 (!%p460_p10), %v1384_v0  ;;  %1008 = vmatprep.mubr.bf16.mxu0 (!%p460_p10), %v1387_v1 }
  0x3b   : > { %s1639_s9 = scalar_lea.vmem (!%p460_p10), [#allocation2], %s1160_s4  ;;  %p507_p11 = scmp.lt.s32.totalorder (!%p460_p10), %s1162_s20, 3 }
  0x3c   : > { %v1286_v2 = vld [vmem:[%s1639_s9 + $0x4] ss:$8 sps:$4 sm:$0xff] (!%p460_p10)   ;;  %v1290_v4 = vld [vmem:[%s1639_s9] ss:$8 sps:$4 sm:$0xff] (!%p460_p10)   ;;  %v1292_v6 = vld [vmem:[%s1639_s9 + $0x14] ss:$8 sps:$4 sm:$0xff] (!%p460_p10)  }
  0x3d   : > { %v1288_v3 = vld [vmem:[%s1639_s9 + $0x104] ss:$8 sps:$4 sm:$0xff] (!%p460_p10)   ;;  %933 = vmatprep.subr.bf16.mxu1 (!%p460_p10), %v1286_v2  ;;  %v1291_v5 = vld [vmem:[%s1639_s9 + $0x100] ss:$8 sps:$4 sm:$0xff] (!%p460_p10)   ;;  %v1294_v7 = vld [vmem:[%s1639_s9 + $0x114] ss:$8 sps:$4 sm:$0xff] (!%p460_p10)  }
  0x3e   : > { %976 = vmatprep.subr.bf16.mxu0 (!%p460_p10), %v1288_v3  ;;  %934 = vmatpush1.bf16.msra.mxu1 (!%p460_p10), %v1290_v4  ;;  %v1296_v8 = vld [vmem:[%s1639_s9 + $0x10] ss:$8 sps:$4 sm:$0xff] (!%p460_p10)   ;;  %v1298_v10 = vld [vmem:[%s1639_s9 + $0x24] ss:$8 sps:$4 sm:$0xff] (!%p460_p10)   ;;  %v1302_v12 = vld [vmem:[%s1639_s9 + $0x20] ss:$8 sps:$4 sm:$0xff] (!%p460_p10)   ;;  %v583_v4 = vlaneseq (!%p460_p10) }
  0x3f   : > { %977 = vmatpush1.bf16.msra.mxu0 (!%p460_p10), %v1291_v5  ;;  %935 = vmatprep.subr.bf16.mxu1 (!%p460_p10), %v1292_v6  ;;  %v1297_v9 = vld [vmem:[%s1639_s9 + $0x110] ss:$8 sps:$4 sm:$0xff] (!%p460_p10)   ;;  %v1300_v11 = vld [vmem:[%s1639_s9 + $0x124] ss:$8 sps:$4 sm:$0xff] (!%p460_p10)   ;;  %v1303_v13 = vld [vmem:[%s1639_s9 + $0x120] ss:$8 sps:$4 sm:$0xff] (!%p460_p10)  }
  0x40   : > { %978 = vmatprep.subr.bf16.mxu0 (!%p460_p10), %v1294_v7  ;;  %v1304_v14 = vld [vmem:[%s1639_s9 + $0x34] ss:$8 sps:$4 sm:$0xff] (!%p460_p10)   ;;  %v1308_v16 = vld [vmem:[%s1639_s9 + $0x30] ss:$8 sps:$4 sm:$0xff] (!%p460_p10)   ;;  %v1310_v18 = vld [vmem:[%s1639_s9 + $0x44] ss:$8 sps:$4 sm:$0xff] (!%p460_p10)  }
  0x41   : > { %v1306_v15 = vld [vmem:[%s1639_s9 + $0x134] ss:$8 sps:$4 sm:$0xff]   ;;  %v1309_v17 = vld [vmem:[%s1639_s9 + $0x130] ss:$8 sps:$4 sm:$0xff]   ;;  %v1312_v19 = vld [vmem:[%s1639_s9 + $0x144] ss:$8 sps:$4 sm:$0xff]  }
  0x42   : > { %936 = vmatpush1.bf16.msra.mxu1 %v1296_v8  ;;  %v1314_v20 = vld [vmem:[%s1639_s9 + $0x40] ss:$8 sps:$4 sm:$0xff]   ;;  %v1316_v22 = vld [vmem:[%s1639_s9 + $0x54] ss:$8 sps:$4 sm:$0xff]   ;;  %v1320_v24 = vld [vmem:[%s1639_s9 + $0x50] ss:$8 sps:$4 sm:$0xff]  }
  0x43   : > { %979 = vmatpush1.bf16.msra.mxu0 %v1297_v9  ;;  %937 = vmatprep.subr.bf16.mxu1 %v1298_v10  ;;  %v1315_v21 = vld [vmem:[%s1639_s9 + $0x140] ss:$8 sps:$4 sm:$0xff]   ;;  %v1318_v23 = vld [vmem:[%s1639_s9 + $0x154] ss:$8 sps:$4 sm:$0xff]   ;;  %v1321_v25 = vld [vmem:[%s1639_s9 + $0x150] ss:$8 sps:$4 sm:$0xff]  }
  0x44   : > { %980 = vmatprep.subr.bf16.mxu0 %v1300_v11  ;;  %v1322_v26 = vld [vmem:[%s1639_s9 + $0x64] ss:$8 sps:$4 sm:$0xff]   ;;  %v1326_v28 = vld [vmem:[%s1639_s9 + $0x60] ss:$8 sps:$4 sm:$0xff]   ;;  %v1328_v30 = vld [vmem:[%s1639_s9 + $0x74] ss:$8 sps:$4 sm:$0xff]  }
  0x45   : > { %v1324_v27 = vld [vmem:[%s1639_s9 + $0x164] ss:$8 sps:$4 sm:$0xff]   ;;  %v1327_v29 = vld [vmem:[%s1639_s9 + $0x160] ss:$8 sps:$4 sm:$0xff]   ;;  %v1330_v31 = vld [vmem:[%s1639_s9 + $0x174] ss:$8 sps:$4 sm:$0xff]  }
  0x46   : > { %938 = vmatpush1.bf16.msra.mxu1 %v1302_v12  ;;  %v1332_v32 = vld [vmem:[%s1639_s9 + $0x70] ss:$8 sps:$4 sm:$0xff]   ;;  %v1334_v34 = vld [vmem:[%s1639_s9 + $0x84] ss:$8 sps:$4 sm:$0xff]   ;;  %v1338_v36 = vld [vmem:[%s1639_s9 + $0x80] ss:$8 sps:$4 sm:$0xff]  }
  0x47   : > { %981 = vmatpush1.bf16.msra.mxu0 %v1303_v13  ;;  %939 = vmatprep.subr.bf16.mxu1 %v1304_v14  ;;  %v1333_v33 = vld [vmem:[%s1639_s9 + $0x170] ss:$8 sps:$4 sm:$0xff]   ;;  %v1336_v35 = vld [vmem:[%s1639_s9 + $0x184] ss:$8 sps:$4 sm:$0xff]   ;;  %v1339_v37 = vld [vmem:[%s1639_s9 + $0x180] ss:$8 sps:$4 sm:$0xff]  }
  0x48   : > { %982 = vmatprep.subr.bf16.mxu0 %v1306_v15  ;;  %v1340_v38 = vld [vmem:[%s1639_s9 + $0x94] ss:$8 sps:$4 sm:$0xff]   ;;  %v1344_v40 = vld [vmem:[%s1639_s9 + $0x90] ss:$8 sps:$4 sm:$0xff]   ;;  %v1346_v42 = vld [vmem:[%s1639_s9 + $0xa4] ss:$8 sps:$4 sm:$0xff]  }
  0x49   : > { %v1342_v39 = vld [vmem:[%s1639_s9 + $0x194] ss:$8 sps:$4 sm:$0xff]   ;;  %v1345_v41 = vld [vmem:[%s1639_s9 + $0x190] ss:$8 sps:$4 sm:$0xff]   ;;  %v1348_v43 = vld [vmem:[%s1639_s9 + $0x1a4] ss:$8 sps:$4 sm:$0xff]  }
  0x4a   : > { %940 = vmatpush1.bf16.msra.mxu1 %v1308_v16  ;;  %v1350_v44 = vld [vmem:[%s1639_s9 + $0xa0] ss:$8 sps:$4 sm:$0xff]   ;;  %v1352_v46 = vld [vmem:[%s1639_s9 + $0xb4] ss:$8 sps:$4 sm:$0xff]   ;;  %v1356_v48 = vld [vmem:[%s1639_s9 + $0xb0] ss:$8 sps:$4 sm:$0xff]  }
  0x4b   : > { %983 = vmatpush1.bf16.msra.mxu0 %v1309_v17  ;;  %941 = vmatprep.subr.bf16.mxu1 %v1310_v18  ;;  %v1351_v45 = vld [vmem:[%s1639_s9 + $0x1a0] ss:$8 sps:$4 sm:$0xff]   ;;  %v1354_v47 = vld [vmem:[%s1639_s9 + $0x1b4] ss:$8 sps:$4 sm:$0xff]   ;;  %v1357_v49 = vld [vmem:[%s1639_s9 + $0x1b0] ss:$8 sps:$4 sm:$0xff]  }
  0x4c   : > { %984 = vmatprep.subr.bf16.mxu0 %v1312_v19  ;;  %v1358_v50 = vld [vmem:[%s1639_s9 + $0xc4] ss:$8 sps:$4 sm:$0xff]   ;;  %v1362_v52 = vld [vmem:[%s1639_s9 + $0xc0] ss:$8 sps:$4 sm:$0xff]   ;;  %v1364_v54 = vld [vmem:[%s1639_s9 + $0xd4] ss:$8 sps:$4 sm:$0xff]  }
  0x4d   : > { %v1360_v51 = vld [vmem:[%s1639_s9 + $0x1c4] ss:$8 sps:$4 sm:$0xff]   ;;  %v1363_v53 = vld [vmem:[%s1639_s9 + $0x1c0] ss:$8 sps:$4 sm:$0xff]   ;;  %v1366_v55 = vld [vmem:[%s1639_s9 + $0x1d4] ss:$8 sps:$4 sm:$0xff]  }
  0x4e   : > { %942 = vmatpush1.bf16.msra.mxu1 %v1314_v20  ;;  %v1368_v56 = vld [vmem:[%s1639_s9 + $0xd0] ss:$8 sps:$4 sm:$0xff]   ;;  %v1370_v58 = vld [vmem:[%s1639_s9 + $0xe4] ss:$8 sps:$4 sm:$0xff]   ;;  %v1374_v60 = vld [vmem:[%s1639_s9 + $0xe0] ss:$8 sps:$4 sm:$0xff]  }
  0x4f   : > { %985 = vmatpush1.bf16.msra.mxu0 %v1315_v21  ;;  %943 = vmatprep.subr.bf16.mxu1 %v1316_v22  ;;  %v1369_v57 = vld [vmem:[%s1639_s9 + $0x1d0] ss:$8 sps:$4 sm:$0xff]   ;;  %v1372_v59 = vld [vmem:[%s1639_s9 + $0x1e4] ss:$8 sps:$4 sm:$0xff]   ;;  %v1375_v61 = vld [vmem:[%s1639_s9 + $0x1e0] ss:$8 sps:$4 sm:$0xff]  }
  0x50   : > { %986 = vmatprep.subr.bf16.mxu0 %v1318_v23  ;;  %v1376_v62 = vld [vmem:[%s1639_s9 + $0xf4] ss:$8 sps:$4 sm:$0xff]   ;;  %v1380_v0 = vld [vmem:[%s1639_s9 + $0xf0] ss:$8 sps:$4 sm:$0xff]   ;;  %s1750_s20 = smov (!%p507_p11, %s1162_s20), 3  ;;  %v584_v5 = vshrl.u32 %v583_v4, 7 }
  0x51   : > { %v1378_v63 = vld [vmem:[%s1639_s9 + $0x1f4] ss:$8 sps:$4 sm:$0xff]   ;;  %v1381_v1 = vld [vmem:[%s1639_s9 + $0x1f0] ss:$8 sps:$4 sm:$0xff]   ;;  %s509_s25 = scalar_lea.vmem %s1740_s2, %s1750_s20  ;;  %s1161_s26 = sshll.u32 %s466_s30, 5 }
  0x52   : > { %944 = vmatpush1.bf16.msra.mxu1 %v1320_v24  ;;  %v1382_v2 = vld [vmem:[%s1738_s0] ss:$16 sps:$4 sm:$0xff]   ;;  %v1385_v3 = vld [vmem:[%s1738_s0 + $0x8] ss:$16 sps:$4 sm:$0xff]   ;;  %v585_v6 = vsub.s32 0, %v584_v5  ;;  %v589_v8 = vsub.s32 1, %v584_v5 }
  0x53   : > { %987 = vmatpush1.bf16.msra.mxu0 %v1321_v25  ;;  %945 = vmatprep.subr.bf16.mxu1 %v1322_v26  ;;  %v581_v7 = vld [vmem:[%s509_s25] sm:$0x3]  ;;  %s497_s27 = scalar_lea.vmem [#allocation3], %s1161_s26  ;;  %s1237_s12 = sshll.u32 (%p1483_p6), %s1418_s14, 4 }
  0x54   : > { %988 = vmatprep.subr.bf16.mxu0 %v1324_v27  ;;  %v586_v9 = vrot.slane %v581_v7, %v585_v6  ;;  %v590_v10 = vrot.slane %v581_v7, %v589_v8  ;;  %s1035_s30 = scalar_lea.vmem (%p1483_p6), %s1741_s3, %s1237_s12 }
  0x56   : > { %946 = vmatpush1.bf16.msra.mxu1 %v1326_v28 }
  0x57   : > { %989 = vmatpush1.bf16.msra.mxu0 %v1327_v29  ;;  %947 = vmatprep.subr.bf16.mxu1 %v1328_v30 }
  0x58   : > { %990 = vmatprep.subr.bf16.mxu0 %v1330_v31 }
  0x5a   : > { %948 = vmatpush1.bf16.msra.mxu1 %v1332_v32 }
  0x5b   : > { %991 = vmatpush1.bf16.msra.mxu0 %v1333_v33  ;;  %949 = vmatprep.subr.bf16.mxu1 %v1334_v34 }
  0x5c   : > { %992 = vmatprep.subr.bf16.mxu0 %v1336_v35 }
  0x5e   : > { %950 = vmatpush1.bf16.msra.mxu1 %v1338_v36 }
  0x5f   : > { %993 = vmatpush1.bf16.msra.mxu0 %v1339_v37  ;;  %951 = vmatprep.subr.bf16.mxu1 %v1340_v38 }
  0x60   : > { %994 = vmatprep.subr.bf16.mxu0 %v1342_v39 }
  0x62   : > { %952 = vmatpush1.bf16.msra.mxu1 %v1344_v40 }
  0x63   : > { %995 = vmatpush1.bf16.msra.mxu0 %v1345_v41  ;;  %953 = vmatprep.subr.bf16.mxu1 %v1346_v42 }
  0x64   : > { %996 = vmatprep.subr.bf16.mxu0 %v1348_v43 }
  0x66   : > { %954 = vmatpush1.bf16.msra.mxu1 %v1350_v44 }
  0x67   : > { %997 = vmatpush1.bf16.msra.mxu0 %v1351_v45  ;;  %955 = vmatprep.subr.bf16.mxu1 %v1352_v46 }
  0x68   : > { %998 = vmatprep.subr.bf16.mxu0 %v1354_v47 }
  0x6a   : > { %956 = vmatpush1.bf16.msra.mxu1 %v1356_v48 }
  0x6b   : > { %999 = vmatpush1.bf16.msra.mxu0 %v1357_v49  ;;  %957 = vmatprep.subr.bf16.mxu1 %v1358_v50 }
  0x6c   : > { %1000 = vmatprep.subr.bf16.mxu0 %v1360_v51 }
  0x6e   : > { %958 = vmatpush1.bf16.msra.mxu1 %v1362_v52 }
  0x6f   : > { %1001 = vmatpush1.bf16.msra.mxu0 %v1363_v53  ;;  %959 = vmatprep.subr.bf16.mxu1 %v1364_v54 }
  0x70   : > { %1002 = vmatprep.subr.bf16.mxu0 %v1366_v55 }
  0x72   : > { %960 = vmatpush1.bf16.msra.mxu1 %v1368_v56 }
  0x73   : > { %1003 = vmatpush1.bf16.msra.mxu0 %v1369_v57  ;;  %961 = vmatprep.subr.bf16.mxu1 %v1370_v58 }
  0x74   : > { %1004 = vmatprep.subr.bf16.mxu0 %v1372_v59 }
  0x76   : > { %962 = vmatpush1.bf16.msra.mxu1 %v1374_v60 }
  0x77   : > { %1005 = vmatpush1.bf16.msra.mxu0 %v1375_v61  ;;  %963 = vmatprep.subr.bf16.mxu1 %v1376_v62 }
  0x78   : > { %1006 = vmatprep.subr.bf16.mxu0 %v1378_v63 }
  0x7a   : > { %964 = vmatpush1.bf16.msra.mxu1 %v1380_v0 }
  0x7b   : > { %1007 = vmatpush1.bf16.msra.mxu0 %v1381_v1 }
  0x7d   : > { %966 = vmatmul.mubr.bf16.vlgmr.msra.gmra.mrb[0].mxu1 %v1382_v2 }
  0x7e   : > { %1009 = vmatmul.mubr.bf16.vlgmr.msra.gmra.mrb[0].mxu0 %v1385_v3 }
 0x150   : > { %v967_v11 = vpop.f32.mrb[0].mxu1 }
 0x151   : > { %v1010_v12 = vpop.f32.mrb[0].mxu0  ;;  %v968_v13 = vadd.f32 %v967_v11, %v586_v9  ;;  %v969_v14 = vpop.f32.mrb[1].mxu1 }
 0x152   : > { %v1012_v15 = vpop.f32.mrb[1].mxu0  ;;  %v970_v16 = vadd.f32 %v969_v14, %v590_v10  ;;  %v971_v17 = vpop.f32.mrb[2].mxu1  ;;  %1029 = sbr.rel (!%p1483_p6) target bundleno = 353 (0x161), region = 74 }
 0x153   : > { %v1014_v18 = vpop.f32.mrb[2].mxu0  ;;  %v1011_v19 = vadd.f32 %v1010_v12, %v968_v13  ;;  %v972_v20 = vadd.f32 %v971_v17, %v586_v9  ;;  %v973_v21 = vpop.f32.mrb[3].mxu1 }
 0x154   : > { %v1016_v22 = vpop.f32.mrb[3].mxu0  ;;  %v1013_v23 = vadd.f32 %v1012_v15, %v970_v16  ;;  %v974_v24 = vadd.f32 %v973_v21, %v590_v10 }
 0x155   : > { %1019 = vst [vmem:[%s497_s27] sm:$0xff] %v1011_v19  ;;  %v1015_v25 = vadd.f32 %v1014_v18, %v972_v20 }
 0x156   : > { %1020 = vst [vmem:[%s497_s27 + $0x8] sm:$0xff] %v1013_v23  ;;  %v1017_v26 = vadd.f32 %v1016_v22, %v974_v24 }
 0x157   : > { %1021 = vst [vmem:[%s497_s27 + $0x10] sm:$0xff] %v1015_v25 }
 0x158   : > { %1022 = vst [vmem:[%s497_s27 + $0x18] sm:$0xff] %v1017_v26 }
 0x15c   : > { %v1048_v27 = vld [vmem:[%s497_s27] sm:$0xff] }
 0x15d   : > { %v1050_v28 = vld [vmem:[%s497_s27 + $0x8] sm:$0xff]  ;;  %1049 = vst [vmem:[%s1035_s30] sm:$0xff] %v1048_v27 }
 0x15e   : > { %v1052_v29 = vld [vmem:[%s497_s27 + $0x10] sm:$0xff]  ;;  %1051 = vst [vmem:[%s1035_s30 + $0x8] sm:$0xff] %v1050_v28 }
 0x15f   : > { %v1054_v30 = vld [vmem:[%s497_s27 + $0x18] sm:$0xff]  ;;  %1053 = vst [vmem:[%s1035_s30 + $0x20] sm:$0xff] %v1052_v29 }
 0x160   : > { %1055 = vst [vmem:[%s1035_s30 + $0x28] sm:$0xff] %v1054_v30 }
 0x161 PF: > { %s13_s16 = sadd.s32 1, %s1426_s16   ;;  %s1743_s12 = smov %s1414_s13 }
 0x162   : > { %p10_p12 = scmp.ge.s32.totalorder %s13_s16, 4   ;;  %s1744_s13 = smov %s1488_s22 }
 0x163   : > { %s1745_s14 = smov %s1422_s15  ;;  %s1746_s15 = smov %s1748_s17 }
 0x164   :  { %12 = sbr.rel (!%p10_p12) target bundleno = 3 (0x3), region = 134 }

</bundles_post_ra>
